<compile_context>
chip_gen: v7x
topology: tpu7x:2x2x1
jax: 0.10.0
libtpu: 0.0.40
codegen_flags: <defaults>
</compile_context>

<pallas_src>
import jax
import jax.numpy as jnp
from jax import lax
from jax.experimental import pallas as pl
from jax.experimental.pallas import tpu as pltpu

# Set to jnp.bfloat16 to halve conv DMA bytes and ~2x MXU throughput at a small
# precision cost (activations and the recurrence stay in f32 either way).
CONV_DTYPE = jnp.float32


def _round_up(x, m):
    return (x + m - 1) // m * m


def qrnn_kernel(x_ref, w_ref, b_ref, c_out_ref, h_out_ref, f_s, c_s):
    """One (batch-row, time-tile) grid step.

    x_ref     : (tT, K*Din)   im2col'd inputs for this tile   (VMEM)
    w_ref     : (K*Din, 3*Hp) gate weights, per-gate lane-padded
    b_ref     : (1, 3*Hp)     gate bias (lane-padded)
    c_out_ref : (tT, Hp)      cell outputs  (reused as the Z buffer)
    h_out_ref : (tT, Hp)      hidden outputs (reused as the O buffer)
    f_s       : (tT, Hp)      forget-gate scratch
    c_s       : (1, Hp)       persistent cell state carried across time tiles
    """
    t_idx = pl.program_id(1)                      # time-tile index (sequential axis)
    tT, Hp = c_out_ref.shape

    # ---- causal conv1d: single fused im2col matmul on the MXU ----
    gates = jnp.dot(x_ref[...].astype(jnp.float32),
                    w_ref[...].astype(jnp.float32),
                    preferred_element_type=jnp.float32)
    gates = gates + b_ref[...]                    # (tT, 3Hp)

    # ---- gate activations; splits are 128-lane aligned (Hp % 128 == 0) ----
    # Z -> c_out buffer, O -> h_out buffer (saves two (tT, Hp) scratches).
    c_out_ref[...] = jnp.tanh(gates[:, :Hp])
    f_s[...] = jax.nn.sigmoid(gates[:, Hp:2 * Hp])
    h_out_ref[...] = jax.nn.sigmoid(gates[:, 2 * Hp:])

    # ---- reset the persistent cell state at the start of every sequence ----
    @pl.when(t_idx == 0)
    def _():
        c_s[...] = jnp.zeros_like(c_s)

    # ---- sequential recurrence: cell state carried in registers, unrolled ----
    def body(t, c):
        z = c_out_ref[pl.ds(t, 1), :]
        f = f_s[pl.ds(t, 1), :]
        o = h_out_ref[pl.ds(t, 1), :]
        c_new = f * c + (1.0 - f) * z
        c_out_ref[pl.ds(t, 1), :] = c_new
        h_out_ref[pl.ds(t, 1), :] = o * c_new
        return c_new

    c_final = lax.fori_loop(0, tT, body, c_s[...], unroll=8)
    c_s[...] = c_final                            # spill carry once per tile


@jax.jit
def qrnn_forward(inputs, conv_w, conv_b):
    """QRNN forward (inference path).

    inputs : (B, T, Din) float32
    conv_w : (3H, Din, K) float32   -- PyTorch nn.Conv1d weight layout
    conv_b : (3H,)        float32
    returns (c, h), each (B, T, H) float32
    """
    B, T, Din = inputs.shape
    H3, _, K = conv_w.shape
    H = H3 // 3

    Hp = _round_up(H, 128)                        # lane-pad each gate to a 128 multiple
    KD = K * Din

    # ---- time tile: multiple of 8, bounded by a modest VMEM budget ----
    bytes_per_t = 4 * (5 * Hp + 2 * KD)           # rough double-buffered cost per time row
    tT_cap = max(8, ((12 * 1024 * 1024) // max(bytes_per_t, 1)) // 8 * 8)
    tT = min(128, _round_up(T, 8), tT_cap)
    T_pad = _round_up(T, tT)

    # ---- glue (stays batch-major; no transposes around the kernel) ----
    # im2col: output row t sees the K causal taps [t-K+1 .. t]  -> (B, T_pad, K*Din)
    x_p = jnp.pad(inputs.astype(jnp.float32), ((0, 0), (K - 1, T_pad - T), (0, 0)))
    x_im2col = jnp.concatenate([x_p[:, j:j + T_pad, :] for j in range(K)], axis=-1)
    x_im2col = x_im2col.astype(CONV_DTYPE)

    # weights: (3H, Din, K) -> (K, Din, 3H) -> per-gate pad H -> Hp -> (K*Din, 3*Hp)
    w_t = jnp.transpose(conv_w, (2, 1, 0)).astype(jnp.float32)        # (K, Din, 3H)
    w_gates = [jnp.pad(w_t[:, :, g * H:(g + 1) * H], ((0, 0), (0, 0), (0, Hp - H)))
               for g in range(3)]
    w_im2col = jnp.concatenate(w_gates, axis=-1).reshape(KD, 3 * Hp).astype(CONV_DTYPE)

    b_gates = [jnp.pad(conv_b[g * H:(g + 1) * H].astype(jnp.float32), (0, Hp - H))
               for g in range(3)]
    bias = jnp.concatenate(b_gates).reshape(1, 3 * Hp)

    grid = (B, T_pad // tT)

    c_pad, h_pad = pl.pallas_call(
        qrnn_kernel,
        out_shape=(
            jax.ShapeDtypeStruct((B, T_pad, Hp), jnp.float32),
            jax.ShapeDtypeStruct((B, T_pad, Hp), jnp.float32),
        ),
        grid_spec=pltpu.PrefetchScalarGridSpec(
            num_scalar_prefetch=0,
            grid=grid,
            in_specs=[
                pl.BlockSpec((None, tT, KD), lambda b, t: (b, t, 0)),      # x (batch squeezed)
                pl.BlockSpec((KD, 3 * Hp), lambda b, t: (0, 0)),           # weights (resident)
                pl.BlockSpec((1, 3 * Hp), lambda b, t: (0, 0)),            # bias (resident)
            ],
            out_specs=[
                pl.BlockSpec((None, tT, Hp), lambda b, t: (b, t, 0)),      # c
                pl.BlockSpec((None, tT, Hp), lambda b, t: (b, t, 0)),      # h
            ],
            scratch_shapes=[
                pltpu.VMEM((tT, Hp), jnp.float32),   # forget gate F (per tile)
                pltpu.VMEM((1, Hp), jnp.float32),    # persistent carried cell state
            ],
        ),
        compiler_params=pltpu.CompilerParams(
            dimension_semantics=("parallel", "arbitrary"),
            vmem_limit_bytes=32 * 1024 * 1024,
        ),
    )(x_im2col, w_im2col, bias)

    # strip the time and lane padding
    return c_pad[:, :T, :H], h_pad[:, :T, :H]


def qrnn_reference(inputs, conv_w, conv_b):
    """Pure-JAX reference mirroring the PyTorch forward (training=False, no attention)."""
    B, T, Din = inputs.shape
    H3, _, K = conv_w.shape
    H = H3 // 3
    x_pad = jnp.pad(inputs, ((0, 0), (K - 1, 0), (0, 0)))
    gates = conv_b[None, None, :]
    for j in range(K):
        gates = gates + jnp.einsum('btd,dh->bth', x_pad[:, j:j + T, :], conv_w[:, :, j].T)
    Z = jnp.tanh(gates[..., :H])
    F = jax.nn.sigmoid(gates[..., H:2 * H])
    O = jax.nn.sigmoid(gates[..., 2 * H:])

    def step(c, zfo):
        z, f, o = zfo
        c_new = f * c + (1.0 - f) * z
        return c_new, (c_new, o * c_new)

    _, (cs, hs) = lax.scan(
        step, jnp.zeros((B, H), jnp.float32),
        (jnp.transpose(Z, (1, 0, 2)), jnp.transpose(F, (1, 0, 2)), jnp.transpose(O, (1, 0, 2))))
    return jnp.transpose(cs, (1, 0, 2)), jnp.transpose(hs, (1, 0, 2))


if __name__ == "__main__":
    # small, module-consistent shapes: batch=2, seq=8, input_size=16, hidden=32, kernel_size=2
    B, T, Din, H, K = 2, 8, 16, 32, 2

    key = jax.random.PRNGKey(0)
    k_x, k_w, k_b = jax.random.split(key, 3)
    x = jax.random.normal(k_x, (B, T, Din), dtype=jnp.float32)
    # deterministic "parameters" matching nn.Conv1d(Din, 3H, K) shapes
    conv_w = jax.random.normal(k_w, (3 * H, Din, K), dtype=jnp.float32) * 0.1
    conv_b = jax.random.normal(k_b, (3 * H,), dtype=jnp.float32) * 0.1
    # NOTE: conv_linear / rnn_linear params exist in the module but are unused
    # on this (memory=None, use_attention=False) forward path.

    c_out, h_out = qrnn_forward(x, conv_w, conv_b)
    jax.block_until_ready((c_out, h_out))

    c_ref, h_ref = qrnn_reference(x, conv_w, conv_b)
    assert c_out.shape == (B, T, H) and h_out.shape == (B, T, H)
    assert jnp.allclose(c_out, c_ref, rtol=1e-3, atol=1e-4), float(jnp.max(jnp.abs(c_out - c_ref)))
    assert jnp.allclose(h_out, h_ref, rtol=1e-3, atol=1e-4), float(jnp.max(jnp.abs(h_out - h_ref)))

    print("KERNEL_OK")
</pallas_src>

<mosaic_0001>
module attributes {stable_mosaic.version = 11 : i64} {
  func.func @qrnn_kernel(%arg0: i32, %arg1: i32, %arg2: memref<1x8x32xf32, #tpu.memory_space<vmem>>, %arg3: memref<32x384xf32, #tpu.memory_space<vmem>>, %arg4: memref<1x384xf32, #tpu.memory_space<vmem>>, %arg5: memref<1x8x128xf32, #tpu.memory_space<vmem>>, %arg6: memref<1x8x128xf32, #tpu.memory_space<vmem>>, %arg7: memref<8x128xf32, #tpu.memory_space<vmem>>, %arg8: memref<1x128xf32, #tpu.memory_space<vmem>>) attributes {dimension_semantics = [#tpu.dimension_semantics<parallel>, #tpu.dimension_semantics<arbitrary>], iteration_bounds = array<i64: 2, 1>, scalar_prefetch = 0 : i64, scratch_operands = 2 : i64, tpu.core_type = #tpu.core_type<tc>, window_params = [{transform_indices = @transform_0, window_bounds = array<i64: 1, 8, 32>}, {pipeline_mode = #tpu.pipeline_mode<synchronous>, transform_indices = @transform_1, window_bounds = array<i64: 32, 384>}, {pipeline_mode = #tpu.pipeline_mode<synchronous>, transform_indices = @transform_2, window_bounds = array<i64: 1, 384>}, {transform_indices = @transform_3, window_bounds = array<i64: 1, 8, 128>}, {transform_indices = @transform_4, window_bounds = array<i64: 1, 8, 128>}]} {
    %c0 = arith.constant 0 : index
    %c0_0 = arith.constant 0 : index
    %c0_1 = arith.constant 0 : index
    %0 = vector.load %arg2[%c0, %c0_0, %c0_1] : memref<1x8x32xf32, #tpu.memory_space<vmem>>, vector<1x8x32xf32>
    %1 = vector.shape_cast %0 : vector<1x8x32xf32> to vector<8x32xf32>
    %c0_2 = arith.constant 0 : index
    %c0_3 = arith.constant 0 : index
    %2 = vector.load %arg3[%c0_2, %c0_3] : memref<32x384xf32, #tpu.memory_space<vmem>>, vector<32x384xf32>
    %cst = arith.constant dense<0.000000e+00> : vector<8x384xf32>
    %3 = tpu.matmul %1, %2, %cst {dimension_numbers = #tpu.dot_dimension_numbers<[1], [0], [0], [1], [0, 0, 1, 1], [], []>} : vector<8x32xf32>, vector<32x384xf32>, vector<8x384xf32> -> vector<8x384xf32>
    %c0_4 = arith.constant 0 : index
    %c0_5 = arith.constant 0 : index
    %4 = vector.load %arg4[%c0_4, %c0_5] : memref<1x384xf32, #tpu.memory_space<vmem>>, vector<1x384xf32>
    %5 = vector.broadcast %4 : vector<1x384xf32> to vector<8x384xf32>
    %6 = arith.addf %3, %5 : vector<8x384xf32>
    %7 = vector.extract_strided_slice %6 {offsets = [0, 0], sizes = [8, 128], strides = [1, 1]} : vector<8x384xf32> to vector<8x128xf32>
    %8 = math.tanh %7 : vector<8x128xf32>
    %c0_6 = arith.constant 0 : index
    %c0_7 = arith.constant 0 : index
    %c0_8 = arith.constant 0 : index
    %9 = vector.load %arg5[%c0_6, %c0_7, %c0_8] : memref<1x8x128xf32, #tpu.memory_space<vmem>>, vector<1x8x128xf32>
    %10 = vector.shape_cast %9 : vector<1x8x128xf32> to vector<8x128xf32>
    %11 = vector.shape_cast %8 : vector<8x128xf32> to vector<1x8x128xf32>
    tpu.vector_store %arg5[%c0_6, %c0_7, %c0_8], %11 {strides = array<i32>} : memref<1x8x128xf32, #tpu.memory_space<vmem>>, vector<1x8x128xf32>,
    %12 = vector.extract_strided_slice %6 {offsets = [0, 128], sizes = [8, 128], strides = [1, 1]} : vector<8x384xf32> to vector<8x128xf32>
    %13 = arith.negf %12 : vector<8x128xf32>
    %14 = math.exp %13 : vector<8x128xf32>
    %cst_9 = arith.constant 1.000000e+00 : f32
    %15 = vector.broadcast %cst_9 : f32 to vector<8x128xf32>
    %16 = arith.addf %15, %14 : vector<8x128xf32>
    %17 = arith.divf %15, %16 : vector<8x128xf32>
    %c0_10 = arith.constant 0 : index
    %c0_11 = arith.constant 0 : index
    %18 = vector.load %arg7[%c0_10, %c0_11] : memref<8x128xf32, #tpu.memory_space<vmem>>, vector<8x128xf32>
    tpu.vector_store %arg7[%c0_10, %c0_11], %17 {strides = array<i32>} : memref<8x128xf32, #tpu.memory_space<vmem>>, vector<8x128xf32>,
    %19 = vector.extract_strided_slice %6 {offsets = [0, 256], sizes = [8, 128], strides = [1, 1]} : vector<8x384xf32> to vector<8x128xf32>
    %20 = arith.negf %19 : vector<8x128xf32>
    %21 = math.exp %20 : vector<8x128xf32>
    %cst_12 = arith.constant 1.000000e+00 : f32
    %22 = vector.broadcast %cst_12 : f32 to vector<8x128xf32>
    %23 = arith.addf %22, %21 : vector<8x128xf32>
    %24 = arith.divf %22, %23 : vector<8x128xf32>
    %c0_13 = arith.constant 0 : index
    %c0_14 = arith.constant 0 : index
    %c0_15 = arith.constant 0 : index
    %25 = vector.load %arg6[%c0_13, %c0_14, %c0_15] : memref<1x8x128xf32, #tpu.memory_space<vmem>>, vector<1x8x128xf32>
    %26 = vector.shape_cast %25 : vector<1x8x128xf32> to vector<8x128xf32>
    %27 = vector.shape_cast %24 : vector<8x128xf32> to vector<1x8x128xf32>
    tpu.vector_store %arg6[%c0_13, %c0_14, %c0_15], %27 {strides = array<i32>} : memref<1x8x128xf32, #tpu.memory_space<vmem>>, vector<1x8x128xf32>,
    %c0_i32 = arith.constant 0 : i32
    %28 = arith.cmpi eq, %arg1, %c0_i32 : i32
    %29 = arith.extui %28 : i1 to i32
    %c0_i32_16 = arith.constant 0 : i32
    %30 = arith.cmpi ne, %29, %c0_i32_16 : i32
    scf.if %30 {
      %cst_102 = arith.constant 0.000000e+00 : f32
      %209 = vector.broadcast %cst_102 : f32 to vector<1x128xf32>
      %c0_103 = arith.constant 0 : index
      %c0_104 = arith.constant 0 : index
      %210 = vector.load %arg8[%c0_103, %c0_104] : memref<1x128xf32, #tpu.memory_space<vmem>>, vector<1x128xf32>
      tpu.vector_store %arg8[%c0_103, %c0_104], %209 {strides = array<i32>} : memref<1x128xf32, #tpu.memory_space<vmem>>, vector<1x128xf32>,
    } else {
    }
    %c0_17 = arith.constant 0 : index
    %c0_18 = arith.constant 0 : index
    %31 = vector.load %arg8[%c0_17, %c0_18] : memref<1x128xf32, #tpu.memory_space<vmem>>, vector<1x128xf32>
    %c0_i32_19 = arith.constant 0 : i32
    %c0_20 = arith.constant 0 : index
    %32 = arith.index_cast %c0_i32_19 : i32 to index
    %c0_21 = arith.constant 0 : index
    %33 = vector.load %arg5[%c0_20, %32, %c0_21] : memref<1x8x128xf32, #tpu.memory_space<vmem>>, vector<1x1x128xf32>
    %34 = vector.shape_cast %33 : vector<1x1x128xf32> to vector<1x128xf32>
    %35 = arith.index_cast %c0_i32_19 : i32 to index
    %c0_22 = arith.constant 0 : index
    %36 = vector.load %arg7[%35, %c0_22] : memref<8x128xf32, #tpu.memory_space<vmem>>, vector<1x128xf32>
    %c0_23 = arith.constant 0 : index
    %37 = arith.index_cast %c0_i32_19 : i32 to index
    %c0_24 = arith.constant 0 : index
    %38 = vector.load %arg6[%c0_23, %37, %c0_24] : memref<1x8x128xf32, #tpu.memory_space<vmem>>, vector<1x1x128xf32>
    %39 = vector.shape_cast %38 : vector<1x1x128xf32> to vector<1x128xf32>
    %40 = arith.mulf %36, %31 : vector<1x128xf32>
    %cst_25 = arith.constant 1.000000e+00 : f32
    %41 = vector.broadcast %cst_25 : f32 to vector<1x128xf32>
    %42 = arith.subf %41, %36 : vector<1x128xf32>
    %43 = arith.mulf %42, %34 : vector<1x128xf32>
    %44 = arith.addf %40, %43 : vector<1x128xf32>
    %c0_26 = arith.constant 0 : index
    %45 = arith.index_cast %c0_i32_19 : i32 to index
    %c0_27 = arith.constant 0 : index
    %46 = vector.load %arg5[%c0_26, %45, %c0_27] : memref<1x8x128xf32, #tpu.memory_space<vmem>>, vector<1x1x128xf32>
    %47 = vector.shape_cast %46 : vector<1x1x128xf32> to vector<1x128xf32>
    %48 = vector.shape_cast %44 : vector<1x128xf32> to vector<1x1x128xf32>
    tpu.vector_store %arg5[%c0_26, %45, %c0_27], %48 {strides = array<i32>} : memref<1x8x128xf32, #tpu.memory_space<vmem>>, vector<1x1x128xf32>,
    %49 = arith.mulf %39, %44 : vector<1x128xf32>
    %c0_28 = arith.constant 0 : index
    %50 = arith.index_cast %c0_i32_19 : i32 to index
    %c0_29 = arith.constant 0 : index
    %51 = vector.load %arg6[%c0_28, %50, %c0_29] : memref<1x8x128xf32, #tpu.memory_space<vmem>>, vector<1x1x128xf32>
    %52 = vector.shape_cast %51 : vector<1x1x128xf32> to vector<1x128xf32>
    %53 = vector.shape_cast %49 : vector<1x128xf32> to vector<1x1x128xf32>
    tpu.vector_store %arg6[%c0_28, %50, %c0_29], %53 {strides = array<i32>} : memref<1x8x128xf32, #tpu.memory_space<vmem>>, vector<1x1x128xf32>,
    %c1_i32 = arith.constant 1 : i32
    %c0_30 = arith.constant 0 : index
    %54 = arith.index_cast %c1_i32 : i32 to index
    %c0_31 = arith.constant 0 : index
    %55 = vector.load %arg5[%c0_30, %54, %c0_31] : memref<1x8x128xf32, #tpu.memory_space<vmem>>, vector<1x1x128xf32>
    %56 = vector.shape_cast %55 : vector<1x1x128xf32> to vector<1x128xf32>
    %57 = arith.index_cast %c1_i32 : i32 to index
    %c0_32 = arith.constant 0 : index
    %58 = vector.load %arg7[%57, %c0_32] : memref<8x128xf32, #tpu.memory_space<vmem>>, vector<1x128xf32>
    %c0_33 = arith.constant 0 : index
    %59 = arith.index_cast %c1_i32 : i32 to index
    %c0_34 = arith.constant 0 : index
    %60 = vector.load %arg6[%c0_33, %59, %c0_34] : memref<1x8x128xf32, #tpu.memory_space<vmem>>, vector<1x1x128xf32>
    %61 = vector.shape_cast %60 : vector<1x1x128xf32> to vector<1x128xf32>
    %62 = arith.mulf %58, %44 : vector<1x128xf32>
    %cst_35 = arith.constant 1.000000e+00 : f32
    %63 = vector.broadcast %cst_35 : f32 to vector<1x128xf32>
    %64 = arith.subf %63, %58 : vector<1x128xf32>
    %65 = arith.mulf %64, %56 : vector<1x128xf32>
    %66 = arith.addf %62, %65 : vector<1x128xf32>
    %c0_36 = arith.constant 0 : index
    %67 = arith.index_cast %c1_i32 : i32 to index
    %c0_37 = arith.constant 0 : index
    %68 = vector.load %arg5[%c0_36, %67, %c0_37] : memref<1x8x128xf32, #tpu.memory_space<vmem>>, vector<1x1x128xf32>
    %69 = vector.shape_cast %68 : vector<1x1x128xf32> to vector<1x128xf32>
    %70 = vector.shape_cast %66 : vector<1x128xf32> to vector<1x1x128xf32>
    tpu.vector_store %arg5[%c0_36, %67, %c0_37], %70 {strides = array<i32>} : memref<1x8x128xf32, #tpu.memory_space<vmem>>, vector<1x1x128xf32>,
    %71 = arith.mulf %61, %66 : vector<1x128xf32>
    %c0_38 = arith.constant 0 : index
    %72 = arith.index_cast %c1_i32 : i32 to index
    %c0_39 = arith.constant 0 : index
    %73 = vector.load %arg6[%c0_38, %72, %c0_39] : memref<1x8x128xf32, #tpu.memory_space<vmem>>, vector<1x1x128xf32>
    %74 = vector.shape_cast %73 : vector<1x1x128xf32> to vector<1x128xf32>
    %75 = vector.shape_cast %71 : vector<1x128xf32> to vector<1x1x128xf32>
    tpu.vector_store %arg6[%c0_38, %72, %c0_39], %75 {strides = array<i32>} : memref<1x8x128xf32, #tpu.memory_space<vmem>>, vector<1x1x128xf32>,
    %c2_i32 = arith.constant 2 : i32
    %c0_40 = arith.constant 0 : index
    %76 = arith.index_cast %c2_i32 : i32 to index
    %c0_41 = arith.constant 0 : index
    %77 = vector.load %arg5[%c0_40, %76, %c0_41] : memref<1x8x128xf32, #tpu.memory_space<vmem>>, vector<1x1x128xf32>
    %78 = vector.shape_cast %77 : vector<1x1x128xf32> to vector<1x128xf32>
    %79 = arith.index_cast %c2_i32 : i32 to index
    %c0_42 = arith.constant 0 : index
    %80 = vector.load %arg7[%79, %c0_42] : memref<8x128xf32, #tpu.memory_space<vmem>>, vector<1x128xf32>
    %c0_43 = arith.constant 0 : index
    %81 = arith.index_cast %c2_i32 : i32 to index
    %c0_44 = arith.constant 0 : index
    %82 = vector.load %arg6[%c0_43, %81, %c0_44] : memref<1x8x128xf32, #tpu.memory_space<vmem>>, vector<1x1x128xf32>
    %83 = vector.shape_cast %82 : vector<1x1x128xf32> to vector<1x128xf32>
    %84 = arith.mulf %80, %66 : vector<1x128xf32>
    %cst_45 = arith.constant 1.000000e+00 : f32
    %85 = vector.broadcast %cst_45 : f32 to vector<1x128xf32>
    %86 = arith.subf %85, %80 : vector<1x128xf32>
    %87 = arith.mulf %86, %78 : vector<1x128xf32>
    %88 = arith.addf %84, %87 : vector<1x128xf32>
    %c0_46 = arith.constant 0 : index
    %89 = arith.index_cast %c2_i32 : i32 to index
    %c0_47 = arith.constant 0 : index
    %90 = vector.load %arg5[%c0_46, %89, %c0_47] : memref<1x8x128xf32, #tpu.memory_space<vmem>>, vector<1x1x128xf32>
    %91 = vector.shape_cast %90 : vector<1x1x128xf32> to vector<1x128xf32>
    %92 = vector.shape_cast %88 : vector<1x128xf32> to vector<1x1x128xf32>
    tpu.vector_store %arg5[%c0_46, %89, %c0_47], %92 {strides = array<i32>} : memref<1x8x128xf32, #tpu.memory_space<vmem>>, vector<1x1x128xf32>,
    %93 = arith.mulf %83, %88 : vector<1x128xf32>
    %c0_48 = arith.constant 0 : index
    %94 = arith.index_cast %c2_i32 : i32 to index
    %c0_49 = arith.constant 0 : index
    %95 = vector.load %arg6[%c0_48, %94, %c0_49] : memref<1x8x128xf32, #tpu.memory_space<vmem>>, vector<1x1x128xf32>
    %96 = vector.shape_cast %95 : vector<1x1x128xf32> to vector<1x128xf32>
    %97 = vector.shape_cast %93 : vector<1x128xf32> to vector<1x1x128xf32>
    tpu.vector_store %arg6[%c0_48, %94, %c0_49], %97 {strides = array<i32>} : memref<1x8x128xf32, #tpu.memory_space<vmem>>, vector<1x1x128xf32>,
    %c3_i32 = arith.constant 3 : i32
    %c0_50 = arith.constant 0 : index
    %98 = arith.index_cast %c3_i32 : i32 to index
    %c0_51 = arith.constant 0 : index
    %99 = vector.load %arg5[%c0_50, %98, %c0_51] : memref<1x8x128xf32, #tpu.memory_space<vmem>>, vector<1x1x128xf32>
    %100 = vector.shape_cast %99 : vector<1x1x128xf32> to vector<1x128xf32>
    %101 = arith.index_cast %c3_i32 : i32 to index
    %c0_52 = arith.constant 0 : index
    %102 = vector.load %arg7[%101, %c0_52] : memref<8x128xf32, #tpu.memory_space<vmem>>, vector<1x128xf32>
    %c0_53 = arith.constant 0 : index
    %103 = arith.index_cast %c3_i32 : i32 to index
    %c0_54 = arith.constant 0 : index
    %104 = vector.load %arg6[%c0_53, %103, %c0_54] : memref<1x8x128xf32, #tpu.memory_space<vmem>>, vector<1x1x128xf32>
    %105 = vector.shape_cast %104 : vector<1x1x128xf32> to vector<1x128xf32>
    %106 = arith.mulf %102, %88 : vector<1x128xf32>
    %cst_55 = arith.constant 1.000000e+00 : f32
    %107 = vector.broadcast %cst_55 : f32 to vector<1x128xf32>
    %108 = arith.subf %107, %102 : vector<1x128xf32>
    %109 = arith.mulf %108, %100 : vector<1x128xf32>
    %110 = arith.addf %106, %109 : vector<1x128xf32>
    %c0_56 = arith.constant 0 : index
    %111 = arith.index_cast %c3_i32 : i32 to index
    %c0_57 = arith.constant 0 : index
    %112 = vector.load %arg5[%c0_56, %111, %c0_57] : memref<1x8x128xf32, #tpu.memory_space<vmem>>, vector<1x1x128xf32>
    %113 = vector.shape_cast %112 : vector<1x1x128xf32> to vector<1x128xf32>
    %114 = vector.shape_cast %110 : vector<1x128xf32> to vector<1x1x128xf32>
    tpu.vector_store %arg5[%c0_56, %111, %c0_57], %114 {strides = array<i32>} : memref<1x8x128xf32, #tpu.memory_space<vmem>>, vector<1x1x128xf32>,
    %115 = arith.mulf %105, %110 : vector<1x128xf32>
    %c0_58 = arith.constant 0 : index
    %116 = arith.index_cast %c3_i32 : i32 to index
    %c0_59 = arith.constant 0 : index
    %117 = vector.load %arg6[%c0_58, %116, %c0_59] : memref<1x8x128xf32, #tpu.memory_space<vmem>>, vector<1x1x128xf32>
    %118 = vector.shape_cast %117 : vector<1x1x128xf32> to vector<1x128xf32>
    %119 = vector.shape_cast %115 : vector<1x128xf32> to vector<1x1x128xf32>
    tpu.vector_store %arg6[%c0_58, %116, %c0_59], %119 {strides = array<i32>} : memref<1x8x128xf32, #tpu.memory_space<vmem>>, vector<1x1x128xf32>,
    %c4_i32 = arith.constant 4 : i32
    %c0_60 = arith.constant 0 : index
    %120 = arith.index_cast %c4_i32 : i32 to index
    %c0_61 = arith.constant 0 : index
    %121 = vector.load %arg5[%c0_60, %120, %c0_61] : memref<1x8x128xf32, #tpu.memory_space<vmem>>, vector<1x1x128xf32>
    %122 = vector.shape_cast %121 : vector<1x1x128xf32> to vector<1x128xf32>
    %123 = arith.index_cast %c4_i32 : i32 to index
    %c0_62 = arith.constant 0 : index
    %124 = vector.load %arg7[%123, %c0_62] : memref<8x128xf32, #tpu.memory_space<vmem>>, vector<1x128xf32>
    %c0_63 = arith.constant 0 : index
    %125 = arith.index_cast %c4_i32 : i32 to index
    %c0_64 = arith.constant 0 : index
    %126 = vector.load %arg6[%c0_63, %125, %c0_64] : memref<1x8x128xf32, #tpu.memory_space<vmem>>, vector<1x1x128xf32>
    %127 = vector.shape_cast %126 : vector<1x1x128xf32> to vector<1x128xf32>
    %128 = arith.mulf %124, %110 : vector<1x128xf32>
    %cst_65 = arith.constant 1.000000e+00 : f32
    %129 = vector.broadcast %cst_65 : f32 to vector<1x128xf32>
    %130 = arith.subf %129, %124 : vector<1x128xf32>
    %131 = arith.mulf %130, %122 : vector<1x128xf32>
    %132 = arith.addf %128, %131 : vector<1x128xf32>
    %c0_66 = arith.constant 0 : index
    %133 = arith.index_cast %c4_i32 : i32 to index
    %c0_67 = arith.constant 0 : index
    %134 = vector.load %arg5[%c0_66, %133, %c0_67] : memref<1x8x128xf32, #tpu.memory_space<vmem>>, vector<1x1x128xf32>
    %135 = vector.shape_cast %134 : vector<1x1x128xf32> to vector<1x128xf32>
    %136 = vector.shape_cast %132 : vector<1x128xf32> to vector<1x1x128xf32>
    tpu.vector_store %arg5[%c0_66, %133, %c0_67], %136 {strides = array<i32>} : memref<1x8x128xf32, #tpu.memory_space<vmem>>, vector<1x1x128xf32>,
    %137 = arith.mulf %127, %132 : vector<1x128xf32>
    %c0_68 = arith.constant 0 : index
    %138 = arith.index_cast %c4_i32 : i32 to index
    %c0_69 = arith.constant 0 : index
    %139 = vector.load %arg6[%c0_68, %138, %c0_69] : memref<1x8x128xf32, #tpu.memory_space<vmem>>, vector<1x1x128xf32>
    %140 = vector.shape_cast %139 : vector<1x1x128xf32> to vector<1x128xf32>
    %141 = vector.shape_cast %137 : vector<1x128xf32> to vector<1x1x128xf32>
    tpu.vector_store %arg6[%c0_68, %138, %c0_69], %141 {strides = array<i32>} : memref<1x8x128xf32, #tpu.memory_space<vmem>>, vector<1x1x128xf32>,
    %c5_i32 = arith.constant 5 : i32
    %c0_70 = arith.constant 0 : index
    %142 = arith.index_cast %c5_i32 : i32 to index
    %c0_71 = arith.constant 0 : index
    %143 = vector.load %arg5[%c0_70, %142, %c0_71] : memref<1x8x128xf32, #tpu.memory_space<vmem>>, vector<1x1x128xf32>
    %144 = vector.shape_cast %143 : vector<1x1x128xf32> to vector<1x128xf32>
    %145 = arith.index_cast %c5_i32 : i32 to index
    %c0_72 = arith.constant 0 : index
    %146 = vector.load %arg7[%145, %c0_72] : memref<8x128xf32, #tpu.memory_space<vmem>>, vector<1x128xf32>
    %c0_73 = arith.constant 0 : index
    %147 = arith.index_cast %c5_i32 : i32 to index
    %c0_74 = arith.constant 0 : index
    %148 = vector.load %arg6[%c0_73, %147, %c0_74] : memref<1x8x128xf32, #tpu.memory_space<vmem>>, vector<1x1x128xf32>
    %149 = vector.shape_cast %148 : vector<1x1x128xf32> to vector<1x128xf32>
    %150 = arith.mulf %146, %132 : vector<1x128xf32>
    %cst_75 = arith.constant 1.000000e+00 : f32
    %151 = vector.broadcast %cst_75 : f32 to vector<1x128xf32>
    %152 = arith.subf %151, %146 : vector<1x128xf32>
    %153 = arith.mulf %152, %144 : vector<1x128xf32>
    %154 = arith.addf %150, %153 : vector<1x128xf32>
    %c0_76 = arith.constant 0 : index
    %155 = arith.index_cast %c5_i32 : i32 to index
    %c0_77 = arith.constant 0 : index
    %156 = vector.load %arg5[%c0_76, %155, %c0_77] : memref<1x8x128xf32, #tpu.memory_space<vmem>>, vector<1x1x128xf32>
    %157 = vector.shape_cast %156 : vector<1x1x128xf32> to vector<1x128xf32>
    %158 = vector.shape_cast %154 : vector<1x128xf32> to vector<1x1x128xf32>
    tpu.vector_store %arg5[%c0_76, %155, %c0_77], %158 {strides = array<i32>} : memref<1x8x128xf32, #tpu.memory_space<vmem>>, vector<1x1x128xf32>,
    %159 = arith.mulf %149, %154 : vector<1x128xf32>
    %c0_78 = arith.constant 0 : index
    %160 = arith.index_cast %c5_i32 : i32 to index
    %c0_79 = arith.constant 0 : index
    %161 = vector.load %arg6[%c0_78, %160, %c0_79] : memref<1x8x128xf32, #tpu.memory_space<vmem>>, vector<1x1x128xf32>
    %162 = vector.shape_cast %161 : vector<1x1x128xf32> to vector<1x128xf32>
    %163 = vector.shape_cast %159 : vector<1x128xf32> to vector<1x1x128xf32>
    tpu.vector_store %arg6[%c0_78, %160, %c0_79], %163 {strides = array<i32>} : memref<1x8x128xf32, #tpu.memory_space<vmem>>, vector<1x1x128xf32>,
    %c6_i32 = arith.constant 6 : i32
    %c0_80 = arith.constant 0 : index
    %164 = arith.index_cast %c6_i32 : i32 to index
    %c0_81 = arith.constant 0 : index
    %165 = vector.load %arg5[%c0_80, %164, %c0_81] : memref<1x8x128xf32, #tpu.memory_space<vmem>>, vector<1x1x128xf32>
    %166 = vector.shape_cast %165 : vector<1x1x128xf32> to vector<1x128xf32>
    %167 = arith.index_cast %c6_i32 : i32 to index
    %c0_82 = arith.constant 0 : index
    %168 = vector.load %arg7[%167, %c0_82] : memref<8x128xf32, #tpu.memory_space<vmem>>, vector<1x128xf32>
    %c0_83 = arith.constant 0 : index
    %169 = arith.index_cast %c6_i32 : i32 to index
    %c0_84 = arith.constant 0 : index
    %170 = vector.load %arg6[%c0_83, %169, %c0_84] : memref<1x8x128xf32, #tpu.memory_space<vmem>>, vector<1x1x128xf32>
    %171 = vector.shape_cast %170 : vector<1x1x128xf32> to vector<1x128xf32>
    %172 = arith.mulf %168, %154 : vector<1x128xf32>
    %cst_85 = arith.constant 1.000000e+00 : f32
    %173 = vector.broadcast %cst_85 : f32 to vector<1x128xf32>
    %174 = arith.subf %173, %168 : vector<1x128xf32>
    %175 = arith.mulf %174, %166 : vector<1x128xf32>
    %176 = arith.addf %172, %175 : vector<1x128xf32>
    %c0_86 = arith.constant 0 : index
    %177 = arith.index_cast %c6_i32 : i32 to index
    %c0_87 = arith.constant 0 : index
    %178 = vector.load %arg5[%c0_86, %177, %c0_87] : memref<1x8x128xf32, #tpu.memory_space<vmem>>, vector<1x1x128xf32>
    %179 = vector.shape_cast %178 : vector<1x1x128xf32> to vector<1x128xf32>
    %180 = vector.shape_cast %176 : vector<1x128xf32> to vector<1x1x128xf32>
    tpu.vector_store %arg5[%c0_86, %177, %c0_87], %180 {strides = array<i32>} : memref<1x8x128xf32, #tpu.memory_space<vmem>>, vector<1x1x128xf32>,
    %181 = arith.mulf %171, %176 : vector<1x128xf32>
    %c0_88 = arith.constant 0 : index
    %182 = arith.index_cast %c6_i32 : i32 to index
    %c0_89 = arith.constant 0 : index
    %183 = vector.load %arg6[%c0_88, %182, %c0_89] : memref<1x8x128xf32, #tpu.memory_space<vmem>>, vector<1x1x128xf32>
    %184 = vector.shape_cast %183 : vector<1x1x128xf32> to vector<1x128xf32>
    %185 = vector.shape_cast %181 : vector<1x128xf32> to vector<1x1x128xf32>
    tpu.vector_store %arg6[%c0_88, %182, %c0_89], %185 {strides = array<i32>} : memref<1x8x128xf32, #tpu.memory_space<vmem>>, vector<1x1x128xf32>,
    %c7_i32 = arith.constant 7 : i32
    %c0_90 = arith.constant 0 : index
    %186 = arith.index_cast %c7_i32 : i32 to index
    %c0_91 = arith.constant 0 : index
    %187 = vector.load %arg5[%c0_90, %186, %c0_91] : memref<1x8x128xf32, #tpu.memory_space<vmem>>, vector<1x1x128xf32>
    %188 = vector.shape_cast %187 : vector<1x1x128xf32> to vector<1x128xf32>
    %189 = arith.index_cast %c7_i32 : i32 to index
    %c0_92 = arith.constant 0 : index
    %190 = vector.load %arg7[%189, %c0_92] : memref<8x128xf32, #tpu.memory_space<vmem>>, vector<1x128xf32>
    %c0_93 = arith.constant 0 : index
    %191 = arith.index_cast %c7_i32 : i32 to index
    %c0_94 = arith.constant 0 : index
    %192 = vector.load %arg6[%c0_93, %191, %c0_94] : memref<1x8x128xf32, #tpu.memory_space<vmem>>, vector<1x1x128xf32>
    %193 = vector.shape_cast %192 : vector<1x1x128xf32> to vector<1x128xf32>
    %194 = arith.mulf %190, %176 : vector<1x128xf32>
    %cst_95 = arith.constant 1.000000e+00 : f32
    %195 = vector.broadcast %cst_95 : f32 to vector<1x128xf32>
    %196 = arith.subf %195, %190 : vector<1x128xf32>
    %197 = arith.mulf %196, %188 : vector<1x128xf32>
    %198 = arith.addf %194, %197 : vector<1x128xf32>
    %c0_96 = arith.constant 0 : index
    %199 = arith.index_cast %c7_i32 : i32 to index
    %c0_97 = arith.constant 0 : index
    %200 = vector.load %arg5[%c0_96, %199, %c0_97] : memref<1x8x128xf32, #tpu.memory_space<vmem>>, vector<1x1x128xf32>
    %201 = vector.shape_cast %200 : vector<1x1x128xf32> to vector<1x128xf32>
    %202 = vector.shape_cast %198 : vector<1x128xf32> to vector<1x1x128xf32>
    tpu.vector_store %arg5[%c0_96, %199, %c0_97], %202 {strides = array<i32>} : memref<1x8x128xf32, #tpu.memory_space<vmem>>, vector<1x1x128xf32>,
    %203 = arith.mulf %193, %198 : vector<1x128xf32>
    %c0_98 = arith.constant 0 : index
    %204 = arith.index_cast %c7_i32 : i32 to index
    %c0_99 = arith.constant 0 : index
    %205 = vector.load %arg6[%c0_98, %204, %c0_99] : memref<1x8x128xf32, #tpu.memory_space<vmem>>, vector<1x1x128xf32>
    %206 = vector.shape_cast %205 : vector<1x1x128xf32> to vector<1x128xf32>
    %207 = vector.shape_cast %203 : vector<1x128xf32> to vector<1x1x128xf32>
    tpu.vector_store %arg6[%c0_98, %204, %c0_99], %207 {strides = array<i32>} : memref<1x8x128xf32, #tpu.memory_space<vmem>>, vector<1x1x128xf32>,
    %c8_i32 = arith.constant 8 : i32
    %c0_100 = arith.constant 0 : index
    %c0_101 = arith.constant 0 : index
    %208 = vector.load %arg8[%c0_100, %c0_101] : memref<1x128xf32, #tpu.memory_space<vmem>>, vector<1x128xf32>
    tpu.vector_store %arg8[%c0_100, %c0_101], %198 {strides = array<i32>} : memref<1x128xf32, #tpu.memory_space<vmem>>, vector<1x128xf32>,
    return
  }
  func.func @transform_0(%arg0: i32, %arg1: i32) -> (i32, i32, i32) {
    %c0_i32 = arith.constant 0 : i32
    %c0_i32_0 = arith.constant 0 : i32
    return %arg0, %arg1, %c0_i32 : i32, i32, i32
  }
  func.func @transform_1(%arg0: i32, %arg1: i32) -> (i32, i32) {
    %c0_i32 = arith.constant 0 : i32
    %c0_i32_0 = arith.constant 0 : i32
    %c0_i32_1 = arith.constant 0 : i32
    return %c0_i32, %c0_i32_0 : i32, i32
  }
  func.func @transform_2(%arg0: i32, %arg1: i32) -> (i32, i32) {
    %c0_i32 = arith.constant 0 : i32
    %c0_i32_0 = arith.constant 0 : i32
    %c0_i32_1 = arith.constant 0 : i32
    return %c0_i32, %c0_i32_0 : i32, i32
  }
  func.func @transform_3(%arg0: i32, %arg1: i32) -> (i32, i32, i32) {
    %c0_i32 = arith.constant 0 : i32
    %c0_i32_0 = arith.constant 0 : i32
    return %arg0, %arg1, %c0_i32 : i32, i32, i32
  }
  func.func @transform_4(%arg0: i32, %arg1: i32) -> (i32, i32, i32) {
    %c0_i32 = arith.constant 0 : i32
    %c0_i32_0 = arith.constant 0 : i32
    return %arg0, %arg1, %c0_i32 : i32, i32, i32
  }
}

</mosaic_0001>

<bundles_post_ra>
// kernel: qrnn_forward.1
= control target key start
LH: loop header
LB: loop body
LE: loop exit
PB: predicated region body
PF: predicated region fallthrough
CT: control target
= control target key end

     0   :  { %10 = vsyncpa [#allocation5], 0  ;;  %s1136_s0 = inlined_call_operand.vmem [shape: f32[2,8,32], index: 0, kind: input, shape index: {}]   ;;  %s1137_s1 = inlined_call_operand.vmem [shape: f32[32,384], index: 1, kind: input, shape index: {}]   ;;  %s1138_s2 = inlined_call_operand.vmem [shape: f32[1,384], index: 2, kind: input, shape index: {}]   ;;  %s1139_s3 = inlined_call_operand.hbm [shape: f32[2,8,128], index: 3, kind: output, shape index: {0}]   ;;  %s1140_s4 = inlined_call_operand.hbm [shape: f32[2,8,128], index: 4, kind: output, shape index: {1}]  }
   0x1   :  { %12 = vsyncpa [#allocation5 + $0x1], 0 }
   0x2   :  { %13 = vsyncpa [#allocation7], 0 }
   0x3   :  { %15 = vsyncpa [#allocation7 + $0x1], 0  ;;  %s910_s15 = smov 0   ;;  %s912_s16 = smov 0  }
   0x4   :  { %s914_s17 = smov 0   ;;  %s916_s18 = smov 0  }
   0x5   :  { %s918_s19 = smov 0   ;;  %s920_s20 = smov 0  }
   0x6 LB: > { %s647_s21 = sadd.s32 4294967295, %s878_s20   ;;  %s648_s22 = sadd.s32 4294967294, %s878_s20   ;;  %s878_s20 = sphi %s920_s20, %s21_s20   ;;  %s874_s19 = sphi %s918_s19, %s1147_s19   ;;  %s870_s18 = sphi %s916_s18, %s1146_s18   ;;  %s866_s17 = sphi %s914_s17, %s1145_s17   ;;  %s862_s16 = sphi %s912_s16, %s1144_s16   ;;  %s858_s15 = sphi %s910_s15, %s1143_s15  }
   0x7   : > { %s33_s23 = sadd.s32 1, %s874_s19  ;;  %s112_s24 = sadd.s32 1, %s866_s17 }
   0x8   : > { %p35_p0 = scmp.ge.s32.totalorder %s33_s23, 2  ;;  %p122_p1 = scmp.ne.s32.totalorder %s866_s17, %s862_s16 }
   0x9   : > { %p123_p2 = scmp.eq.s32.totalorder %s647_s21, 1  ;;  %p128_p3 = scmp.ne.s32.totalorder %s862_s16, %s858_s15 }
   0xa   : > { %s1149_s23 = smov (%p35_p0, %s33_s23), 0  ;;  %p129_p5 = scmp.eq.s32.totalorder %s648_s22, 1 }
   0xb   : > { %p950_p4 = por %p123_p2, %p122_p1  ;;  %s107_s26 = ssub.s32 %s874_s19, %s1149_s23 }
   0xc   : > { %p651_p6 = scmp.ge.s32.totalorder %s878_s20, 1  ;;  %p110_p7 = scmp.eq.s32.totalorder %s107_s26, 0 }
   0xd   : > { %p957_p8 = por %p129_p5, %p128_p3  ;;  %p191_p9 = scmp.lt.s32.totalorder %s878_s20, 3 }
   0xe   : > { %s963_s28 = scalar_select %p110_p7, %s866_s17, %s112_s24  }
   0xf   : > { %p192_p10 = pnand %p651_p6, %p191_p9 }
  0x10   : > { %v233_v0 = vld [vmem:[%s1137_s1 + $0x8] sm:$0xff] (!%p192_p10)  ;;  %v236_v1 = vld [vmem:[%s1137_s1 + $0x20] sm:$0xff] (!%p192_p10)  ;;  %p224_p11 = scmp.lt.s32.totalorder (!%p192_p10), %s870_s18, 1  ;;  %v235_v4 = vld [vmem:[%s1137_s1 + $0x18] sm:$0xff] (!%p192_p10)  ;;  %v880_v7 = vmov (!%p192_p10), 0.0   ;;  %v881_v8 = vmov (!%p192_p10), 0.0|0.0   ;;  %v246_v21 = vlaneseq (!%p192_p10) }
  0x11   : > { %195 = sbr.rel (%p192_p10) target bundleno = 349 (0x15d), region = 32  ;;  %v232_v2 = vld [vmem:[%s1137_s1] sm:$0xff] (!%p192_p10)  ;;  %v681_v3 = vpack.c.bf16 (!%p192_p10), %v236_v1, %v233_v0  ;;  %v239_v5 = vld [vmem:[%s1137_s1 + $0x38] sm:$0xff] (!%p192_p10)  ;;  %v242_v6 = vld [vmem:[%s1137_s1 + $0x50] sm:$0xff] (!%p192_p10)  ;;  %329 = vmatprep.mubr.f32.mxu0 (!%p192_p10), %v880_v7  ;;  %426 = vst [vmem:[#allocation3] sm:$0x1] (!%p192_p10), %v880_v7  ;;  %689 = vmatprep.subr.bf16.mxu1 (!%p192_p10), %v881_v8 }
  0x12   : > { %v683_v9 = vpack.c.bf16 (!%p192_p10), %v235_v4, %v232_v2  ;;  %v685_v10 = vpack.c.bf16 (!%p192_p10), %v242_v6, %v239_v5  ;;  %v238_v11 = vld [vmem:[%s1137_s1 + $0x30] sm:$0xff] (!%p192_p10)  ;;  %v241_v12 = vld [vmem:[%s1137_s1 + $0x48] sm:$0xff] (!%p192_p10)  ;;  %vm882_vm0 = vmmov (!%p192_p10), 0   ;;  %v240_v15 = vld [vmem:[%s1137_s1 + $0x40] sm:$0xff] (!%p192_p10)  ;;  %vm261_vm1 = vcmask (!%p192_p10), 261120   ;;  %s1012_s26 = sand.u32 (!%p192_p10), 1, %s862_s16  }
  0x13   : > { %v234_v13 = vld [vmem:[%s1137_s1 + $0x10] sm:$0xff] (!%p192_p10)  ;;  %678 = vmatprep.mubr.msk.f32.mxu1 (!%p192_p10), %vm882_vm0, %v880_v7  ;;  %682 = vmatprep.subr.bf16.mxu0 (!%p192_p10), %v681_v3  ;;  %v237_v14 = vld [vmem:[%s1137_s1 + $0x28] sm:$0xff] (!%p192_p10)  ;;  %v243_v16 = vld [vmem:[%s1137_s1 + $0x58] sm:$0xff] (!%p192_p10)  ;;  %v687_v17 = vpack.c.bf16 (!%p192_p10), %v241_v12, %v238_v11  ;;  %v247_v22 = vshrl.u32 (!%p192_p10), %v246_v21, 7  ;;  %s661_s6 = sshll.u32 (!%p192_p10), %s870_s18, 7  ;;  %s510_s14 = scalar_lea.sflag (!%p192_p10), [#allocation5], %s1012_s26 }
  0x14   : > { %684 = vmatpush1.bf16.msra.mxu0 (!%p192_p10), %v683_v9  ;;  %v690_v18 = vpack.c.bf16 (!%p192_p10), %v237_v14, %v234_v13  ;;  %v693_v19 = vpack.c.bf16 (!%p192_p10), %v243_v16, %v240_v15  ;;  %v244_v24 = vld [vmem:[%s1138_s2] sm:$0x7] (!%p192_p10)  ;;  %s1056_s11 = scalar_lea.hbm (!%p192_p10), %s1139_s3, %s661_s6  ;;  %s1065_s13 = scalar_lea.hbm (!%p192_p10), %s1140_s4, %s661_s6 }
  0x15   : > { %686 = vmatprep.subr.bf16.mxu0 (!%p192_p10), %v685_v10  ;;  %v248_v23 = vsub.s32 (!%p192_p10), 0, %v247_v22  ;;  %v252_v25 = vsub.s32 (!%p192_p10), 1, %v247_v22  ;;  %v256_v26 = vsub.s32 (!%p192_p10), 2, %v247_v22  ;;  %s883_s22 = smov (!%p192_p10), [#allocation4]  }
  0x16   : > { %691 = vmatpush3.bf16.msra.mxu1 (!%p192_p10), %v690_v18  ;;  %s772_s24 = sshll.u32 (!%p192_p10), %s883_s22, 4  ;;  %s773_s24 = int_to_ptr.vmem [resolvable:$false] %s772_s24 }
  0x17   : > { %692 = vmatprep.subr.bf16.mxu1 (!%p192_p10), %v881_v8  ;;  %v249_v27 = vrot.slane (!%p192_p10), %v244_v24, %v248_v23  ;;  %v253_v28 = vrot.slane (!%p192_p10), %v244_v24, %v252_v25  ;;  %v257_v29 = vrot.slane (!%p192_p10), %v244_v24, %v256_v26 }
  0x18   : > { %s225_s29 = scalar_select %p224_p11, %s870_s18, 1  ;;  %688 = vmatpush1.bf16.msra.mxu0 %v687_v17  ;;  %v427_v46 = vld [vmem:[#allocation3] sm:$0x1] }
  0x1a   : > { %s654_s12 = sshll.u32 %s225_s29, 3  ;;  %694 = vmatpush3.bf16.msra.mxu1 %v693_v19  ;;  %s652_s29 = sshll.u32 %s1012_s26, 3 }
  0x1b   : > { %s230_s21 = scalar_lea.vmem %s1136_s0, %s654_s12  ;;  %s1015_s30 = scalar_lea.vmem [#allocation4], %s652_s29 }
  0x1c   : > { %v231_v20 = vld [vmem:[%s230_s21] sm:$0xff]  ;;  %s1018_s5 = scalar_lea.vmem [#allocation6], %s652_s29  ;;  %s529_s7 = sshll.u32 %s1015_s30, 4  ;;  %s1058_s7 = int_to_ptr.vmem [resolvable:$true] %s529_s7 }
  0x1d   : > { %655 = vmatmul.mubr.msk.f32.vlgmr.msra.gmra.mrb[0].mxu0 %vm261_vm1, %v231_v20  ;;  %679 = vmatmul.mubr.msk.f32.vlgmr.msra.gmra.mrb[0].mxu1 %vm261_vm1, %v231_v20  ;;  %s543_s8 = sshll.u32 %s1018_s5, 4  ;;  %s768_s21 = scalar_lea.vmem %s1058_s7, 128  ;;  %s1067_s8 = int_to_ptr.vmem [resolvable:$true] %s543_s8 }
  0x1e   : > { %p769_p12 = scmp.ne.s32.totalorder %s1058_s7, %s768_s21  ;;  %s774_s29 = scalar_lea.vmem %s773_s24, 256 }
  0x1f   : > { %p775_p1 = scmp.lt.s32.totalorder %s1058_s7, %s773_s24  ;;  %p776_p2 = scmp.lt.s32.totalorder %s774_s29, %s768_s21 }
  0x20   : > { %p770_p13 = pnand %p769_p12, %p950_p4 }
  0x21   : > { %p777_p3 = por %p776_p2, %p775_p1 }
  0x22   : > { %p771_p0 = pneg %p770_p13 }
  0x24   : > { %p778_p5 = pnand %p777_p3, %p771_p0 }
  0xf0   : > { %v331_v30 = vpop.f32.mrb[0].mxu0  ;;  %v402_v34 = vpop.f32.mrb[0].mxu1 }
  0xf1   : > { %v332_v31 = vadd.f32 %v331_v30, %v249_v27  ;;  %v333_v32 = vpop.f32.mrb[1].mxu0  ;;  %v403_v35 = vadd.f32 %v402_v34, %v257_v29  ;;  %v680_v36 = vpop.f32.mrb[1].mxu1 }
  0xf2   : > { %v334_v33 = vadd.f32 %v333_v32, %v253_v28 }
  0xf3   : > { %758 = vtanh.f32 %v332_v31  ;;  %v658_v38 = vmul.f32 -1.442695, %v403_v35 }
  0xf4   : > { %v657_v37 = vmul.f32 -1.442695, %v334_v33 }
  0xf6   : > { %760 = vpow2.f32 %v657_v37 }
  0xf7   : > { %762 = vpow2.f32 %v658_v38 }
  0xfd   : > { %v759_v39 = vpop.eup %758 }
  0xfe   : > { %407 = vst [vmem:[%s1015_s30] sm:$0xff] %v759_v39 }
 0x100   : > { %v761_v40 = vpop.eup %760 }
 0x101   : > { %v763_v41 = vpop.eup %762  ;;  %v411_v42 = vadd.f32 1.0, %v761_v40 }
 0x102   : > { %v418_v43 = vadd.f32 1.0, %v763_v41 }
 0x103   : > { %764 = vrcp.f32 %v411_v42 }
 0x104   : > { %766 = vrcp.f32 %v418_v43 }
 0x105   : > { %v428_v50 = vld [vmem:[%s1015_s30] sm:$0x1]  ;;  %v438_v57 = vld [vmem:[%s1015_s30 + $0x1] sm:$0x1]  ;;  %v448_v1 = vld [vmem:[%s1015_s30 + $0x2] sm:$0x1] }
 0x106   : > { %v458_v9 = vld [vmem:[%s1015_s30 + $0x3] sm:$0x1]  ;;  %v468_v17 = vld [vmem:[%s1015_s30 + $0x4] sm:$0x1]  ;;  %v478_v25 = vld [vmem:[%s1015_s30 + $0x5] sm:$0x1] }
 0x107   : > { %v488_v33 = vld [vmem:[%s1015_s30 + $0x6] sm:$0x1]  ;;  %v498_v40 = vld [vmem:[%s1015_s30 + $0x7] sm:$0x1] }
 0x10d   : > { %v765_v44 = vpop.eup %764 }
 0x10e   : > { %v767_v45 = vpop.eup %766  ;;  %414 = vst [vmem:[#allocation2] sm:$0xff] %v765_v44 }
 0x10f   : > { %421 = vst [vmem:[%s1018_s5] sm:$0xff] %v767_v45 }
 0x115   : > { %v429_v47 = vld [vmem:[#allocation2] sm:$0x1]  ;;  %v439_v48 = vld [vmem:[#allocation2 + $0x1] sm:$0x1]  ;;  %v449_v54 = vld [vmem:[#allocation2 + $0x2] sm:$0x1] }
 0x116   : > { %v432_v49 = vsub.f32 1.0, %v429_v47  ;;  %v431_v51 = vmul.f32 %v429_v47, %v427_v46  ;;  %v442_v53 = vsub.f32 1.0, %v439_v48  ;;  %v430_v55 = vld [vmem:[%s1018_s5] sm:$0x1]  ;;  %v452_v60 = vsub.f32 1.0, %v449_v54 }
 0x117   : > { %v459_v62 = vld [vmem:[#allocation2 + $0x3] sm:$0x1]  ;;  %v440_v63 = vld [vmem:[%s1018_s5 + $0x1] sm:$0x1]  ;;  %v469_v6 = vld [vmem:[#allocation2 + $0x4] sm:$0x1] }
 0x118   : > { %v433_v52 = vmul.f32 %v432_v49, %v428_v50  ;;  %v443_v59 = vmul.f32 %v442_v53, %v438_v57  ;;  %v453_v3 = vmul.f32 %v452_v60, %v448_v1  ;;  %v462_v4 = vsub.f32 1.0, %v459_v62  ;;  %v450_v7 = vld [vmem:[%s1018_s5 + $0x2] sm:$0x1]  ;;  %v479_v14 = vld [vmem:[#allocation2 + $0x5] sm:$0x1] }
 0x119   : > { %v472_v12 = vsub.f32 1.0, %v469_v6  ;;  %v460_v15 = vld [vmem:[%s1018_s5 + $0x3] sm:$0x1]  ;;  %v482_v20 = vsub.f32 1.0, %v479_v14  ;;  %v489_v22 = vld [vmem:[#allocation2 + $0x6] sm:$0x1] }
 0x11a   : > { %v434_v56 = vadd.f32 %v433_v52, %v431_v51  ;;  %v463_v11 = vmul.f32 %v462_v4, %v458_v9  ;;  %v470_v23 = vld [vmem:[%s1018_s5 + $0x4] sm:$0x1]  ;;  %v492_v28 = vsub.f32 1.0, %v489_v22  ;;  %v499_v30 = vld [vmem:[#allocation2 + $0x7] sm:$0x1] }
 0x11b   : > { %v473_v19 = vmul.f32 %v472_v12, %v468_v17  ;;  %v483_v27 = vmul.f32 %v482_v20, %v478_v25  ;;  %v480_v31 = vld [vmem:[%s1018_s5 + $0x5] sm:$0x1]  ;;  %v502_v36 = vsub.f32 1.0, %v499_v30  ;;  %v490_v38 = vld [vmem:[%s1018_s5 + $0x6] sm:$0x1] }
 0x11c   : > { %435 = vst [vmem:[%s1015_s30] sm:$0x1] %v434_v56  ;;  %v441_v58 = vmul.f32 %v439_v48, %v434_v56  ;;  %v436_v61 = vmul.f32 %v434_v56, %v430_v55  ;;  %v493_v35 = vmul.f32 %v492_v28, %v488_v33  ;;  %v500_v44 = vld [vmem:[%s1018_s5 + $0x7] sm:$0x1] }
 0x11d   : > { %v503_v42 = vmul.f32 %v502_v36, %v498_v40 }
 0x11e   : > { %v444_v0 = vadd.f32 %v443_v59, %v441_v58  ;;  %437 = vst [vmem:[%s1018_s5] sm:$0x1] %v436_v61 }
 0x120   : > { %445 = vst [vmem:[%s1015_s30 + $0x1] sm:$0x1] %v444_v0  ;;  %v451_v2 = vmul.f32 %v449_v54, %v444_v0  ;;  %v446_v5 = vmul.f32 %v444_v0, %v440_v63 }
 0x122   : > { %v454_v8 = vadd.f32 %v453_v3, %v451_v2  ;;  %447 = vst [vmem:[%s1018_s5 + $0x1] sm:$0x1] %v446_v5 }
 0x124   : > { %455 = vst [vmem:[%s1015_s30 + $0x2] sm:$0x1] %v454_v8  ;;  %v461_v10 = vmul.f32 %v459_v62, %v454_v8  ;;  %v456_v13 = vmul.f32 %v454_v8, %v450_v7 }
 0x126   : > { %v464_v16 = vadd.f32 %v463_v11, %v461_v10  ;;  %457 = vst [vmem:[%s1018_s5 + $0x2] sm:$0x1] %v456_v13 }
 0x128   : > { %465 = vst [vmem:[%s1015_s30 + $0x3] sm:$0x1] %v464_v16  ;;  %v471_v18 = vmul.f32 %v469_v6, %v464_v16  ;;  %v466_v21 = vmul.f32 %v464_v16, %v460_v15 }
 0x12a   : > { %v474_v24 = vadd.f32 %v473_v19, %v471_v18  ;;  %467 = vst [vmem:[%s1018_s5 + $0x3] sm:$0x1] %v466_v21 }
 0x12c   : > { %475 = vst [vmem:[%s1015_s30 + $0x4] sm:$0x1] %v474_v24  ;;  %v481_v26 = vmul.f32 %v479_v14, %v474_v24  ;;  %v476_v29 = vmul.f32 %v474_v24, %v470_v23 }
 0x12e   : > { %v484_v32 = vadd.f32 %v483_v27, %v481_v26  ;;  %477 = vst [vmem:[%s1018_s5 + $0x4] sm:$0x1] %v476_v29 }
 0x130   : > { %485 = vst [vmem:[%s1015_s30 + $0x5] sm:$0x1] %v484_v32  ;;  %v491_v34 = vmul.f32 %v489_v22, %v484_v32  ;;  %v486_v37 = vmul.f32 %v484_v32, %v480_v31 }
 0x132   : > { %v494_v39 = vadd.f32 %v493_v35, %v491_v34  ;;  %487 = vst [vmem:[%s1018_s5 + $0x5] sm:$0x1] %v486_v37 }
 0x134   : > { %495 = vst [vmem:[%s1015_s30 + $0x6] sm:$0x1] %v494_v39  ;;  %v501_v41 = vmul.f32 %v499_v30, %v494_v39  ;;  %v496_v43 = vmul.f32 %v494_v39, %v490_v38 }
 0x136   : > { %v504_v45 = vadd.f32 %v503_v42, %v501_v41  ;;  %497 = vst [vmem:[%s1018_s5 + $0x6] sm:$0x1] %v496_v43 }
 0x138   : > { %505 = vst [vmem:[%s1015_s30 + $0x7] sm:$0x1] %v504_v45  ;;  %508 = vst [vmem:[#allocation3] sm:$0x1] %v504_v45  ;;  %v506_v46 = vmul.f32 %v504_v45, %v500_v44 }
 0x139   : > { %781 = shalt.err (!%p778_p5)
}
 0x13a   : > { %s782_s30 = scalar_lea.hbm %s1056_s11, 128  ;;  %s786_s10 = scalar_lea.hbm %s1139_s3, 256 }
 0x13b   : > { %p783_p6 = scmp.ne.s32.totalorder %s1056_s11, %s782_s30  ;;  %p787_p10 = scmp.lt.u32.totalorder %s1056_s11, %s1139_s3 }
 0x13c   : > { %p788_p11 = scmp.lt.u32.totalorder %s786_s10, %s782_s30  ;;  %p790_p13 = scmp.lt.u32.totalorder %s782_s30, %s1056_s11 }
 0x13d   : > { %p784_p7 = pnand %p783_p6, %p950_p4 }
 0x13e   : > { %p789_p12 = por %p788_p11, %p787_p10 }
 0x13f   : > { %p785_p9 = pneg %p784_p7 }
 0x140   : > { %p791_p0 = por %p790_p13, %p789_p12 }
 0x142   : > { %p792_p1 = pnand %p791_p0, %p785_p9 }
 0x144   : > { %795 = shalt.err (!%p792_p1)
}
 0x145   : > { %695 = dma.vmem_to_hbm [thread:$0]  (%p950_p4), %s1058_s7, 128, %s1056_s11, %s510_s14   ;;  %507 = vst [vmem:[%s1018_s5 + $0x7] sm:$0x1] %v506_v46 }
 0x146   : > { %s515_s21 = scalar_lea.sflag [#allocation7], %s1012_s26  ;;  %s796_s22 = scalar_lea.vmem %s1067_s8, 128 }
 0x147   : > { %p797_p2 = scmp.ne.s32.totalorder %s1067_s8, %s796_s22  ;;  %s884_s24 = smov [#allocation6]  }
 0x148   : > { %s800_s29 = sshll.u32 %s884_s24, 4  ;;  %s801_s29 = int_to_ptr.vmem [resolvable:$false] %s800_s29 }
 0x149   : > { %p798_p3 = pnand %p797_p2, %p950_p4  ;;  %s802_s30 = scalar_lea.vmem %s801_s29, 256 }
 0x14a   : > { %p803_p6 = scmp.lt.s32.totalorder %s1067_s8, %s801_s29  ;;  %p804_p7 = scmp.lt.s32.totalorder %s802_s30, %s796_s22 }
 0x14b   : > { %p799_p5 = pneg %p798_p3 }
 0x14c   : > { %p805_p9 = por %p804_p7, %p803_p6 }
 0x14e   : > { %p806_p10 = pnand %p805_p9, %p799_p5 }
 0x150   : > { %809 = shalt.err (!%p806_p10)
}
 0x151   : > { %s810_s26 = scalar_lea.hbm %s1065_s13, 128  ;;  %s814_s11 = scalar_lea.hbm %s1140_s4, 256 }
 0x152   : > { %p811_p11 = scmp.ne.s32.totalorder %s1065_s13, %s810_s26  ;;  %p815_p0 = scmp.lt.u32.totalorder %s1065_s13, %s1140_s4 }
 0x153   : > { %p816_p1 = scmp.lt.u32.totalorder %s814_s11, %s810_s26  ;;  %p818_p3 = scmp.lt.u32.totalorder %s810_s26, %s1065_s13 }
 0x154   : > { %p812_p12 = pnand %p811_p11, %p950_p4 }
 0x155   : > { %p817_p2 = por %p816_p1, %p815_p0 }
 0x156   : > { %p813_p13 = pneg %p812_p12 }
 0x157   : > { %p819_p5 = por %p818_p3, %p817_p2 }
 0x159   : > { %p820_p6 = pnand %p819_p5, %p813_p13 }
 0x15b   : > { %823 = shalt.err (!%p820_p6)
}
 0x15c   : > { %696 = dma.vmem_to_hbm [thread:$0]  (%p950_p4), %s1067_s8, 128, %s1065_s13, %s515_s21  }
 0x15d PF: > { %p706_p7 = scmp.ge.s32.totalorder %s878_s20, 2  ;;  %s555_s9 = sand.u32 1, %s858_s15  }
 0x15e   : > { %s556_s10 = scalar_lea.sflag [#allocation5], %s555_s9 }
 0x15f   : > { %p700_p9 = pnand %p706_p7, %p957_p8 }
 0x161   : > { %849 = dma.done.wait (!%p700_p9), %s556_s10, 128  }
 0x162   : > { %851 = vsyncadd (!%p700_p9), %s556_s10, 4294967168  ;;  %s565_s18 = scalar_lea.sflag [#allocation7], %s555_s9 }
 0x163   : > { %853 = dma.done.wait (!%p700_p9), %s565_s18, 128  }
 0x164   : > { %855 = vsyncadd (!%p700_p9), %s565_s18, 4294967168  ;;  %s21_s20 = sadd.s32 1, %s878_s20   ;;  %s1143_s15 = smov %s862_s16 }
 0x165   : > { %p18_p10 = scmp.ge.s32.totalorder %s21_s20, 4   ;;  %s1144_s16 = smov %s866_s17 }
 0x166   : > { %s1145_s17 = smov %s963_s28  ;;  %s1146_s18 = smov %s874_s19 }
 0x167   : > { %s1147_s19 = smov %s1149_s23  ;;  %20 = sbr.rel (!%p18_p10) target bundleno = 6 (0x6), region = 88 }
 0x16e   :  { %570 = vsyncpa [#allocation5], 1 }
 0x16f   :  { %572 = vsyncpa [#allocation5 + $0x1], 1 }
 0x170   :  { %573 = vsyncpa [#allocation7], 1 }
 0x171   :  { %575 = vsyncpa [#allocation7 + $0x1], 1 }

</bundles_post_ra>
